<compile_context>
chip_gen: v7x
topology: tpu7x:2x2x1
jax: 0.10.0
libtpu: 0.0.40
codegen_flags: <defaults>
</compile_context>

<pallas_src>
import functools
import math

import jax
import jax.numpy as jnp
from jax.experimental import pallas as pl
from jax.experimental.pallas import tpu as pltpu


def _linformer_kernel(w_ref, q_ref, k_ref, v_ref, mask_ref, e_ref, o_ref, *, mxu_dtype):
    # Views per grid step (one batch element, all heads):
    #   w_ref    : (H, KH)      f32 in SMEM (scalar-prefetched conv weights)
    #   q/k/v/o  : (1, H, S, D) f32 in VMEM
    #   mask_ref : (1, S, 1)    f32 in VMEM
    #   e_ref    : (H, Lk, S)   f32 in VMEM (fetched once, reused for every step)
    H = q_ref.shape[1]
    S = q_ref.shape[2]
    D = q_ref.shape[3]
    KH = w_ref.shape[1]

    def mm(subscripts, a, b):
        # Head-batched contraction on the MXU; operands optionally cast (bf16) while
        # accumulating in f32.  No explicit transposes -> Mosaic picks native layouts.
        return jnp.einsum(subscripts, a.astype(mxu_dtype), b.astype(mxu_dtype),
                          preferred_element_type=jnp.float32)

    q = q_ref[0]                      # (H, S, D)
    k = k_ref[0]                      # (H, S, D)
    v = v_ref[0]                      # (H, S, D)
    m = mask_ref[0]                   # (S, 1)
    e = e_ref[...]                    # (H, Lk, S)

    km = k * m[None]                  # KK = K * mask
    vm = v * m[None]                  # VV = V * mask (also conv input V_orig * mask)

    # Linformer projections: K' = E @ (K*mask), V' = E @ (V*mask)   -> (H, Lk, D)
    kp = mm('hks,hsd->hkd', e, km)
    vp = mm('hks,hsd->hkd', e, vm)

    # Path 1: softmax(Q K'^T / sqrt(D)) V'                          -> (H, S, D)
    dot = mm('hsd,hkd->hsk', q, kp) * (1.0 / math.sqrt(D))
    dot = dot - jnp.max(dot, axis=-1, keepdims=True)
    p = jnp.exp(dot)
    # approx=True would move the divide to the EUP slot; kept exact so the demo
    # stays within 1e-4 of the f32 reference.
    attn = p * pl.reciprocal(jnp.sum(p, axis=-1, keepdims=True), approx=False)
    x = mm('hsk,hkd->hsd', attn, vp)

    # Path 2: VV @ softmax(Q^T KK / sqrt(S))                        -> (H, S, D)
    dot1 = mm('hsd,hse->hde', q, km) * (1.0 / math.sqrt(S))
    dot1 = dot1 - jnp.max(dot1, axis=-1, keepdims=True)
    p1 = jnp.exp(dot1)
    attn1 = p1 * pl.reciprocal(jnp.sum(p1, axis=-1, keepdims=True), approx=False)
    x = x + mm('hsd,hde->hse', vm, attn1)

    # Depthwise conv along the sequence axis (cross-correlation, zero padding),
    # built from XLU rolls + iota edge masks; weights are SMEM scalars.
    pad = KH // 2
    seq = jax.lax.broadcasted_iota(jnp.int32, (S, 1), 0)
    taps = []
    for j in range(KH):               # KH is small & static
        off = j - pad                 # tap j reads vm[s + off] (zero outside [0, S))
        if off == 0:
            taps.append(vm)
        else:
            rolled = pltpu.roll(vm, shift=(-off) % S, axis=1)
            valid = (seq >= max(-off, 0)) & (seq < min(S - off, S))
            taps.append(jnp.where(valid[None, :, :], rolled, 0.0))

    conv_heads = []
    for h in range(H):                # static unroll; scalar (SMEM) * vector taps
        acc = taps[0][h] * w_ref[h, 0]
        for j in range(1, KH):
            acc = acc + taps[j][h] * w_ref[h, j]
        conv_heads.append(acc)
    x = x + jnp.stack(conv_heads, axis=0)

    o_ref[0] = x.astype(o_ref.dtype)


def linformer_attention(Q, K, V, mask, E, conv_w, *, mxu_dtype=jnp.float32):
    """Q,K,V: (B,H,S,D) f32; mask: (B,S); E: (H,Lk,S); conv_w: (H,KH)."""
    B, H, S, D = Q.shape
    Lk = E.shape[1]
    KH = conv_w.shape[1]

    mask3 = mask.reshape(B, S, 1).astype(jnp.float32)

    bhsd = pl.BlockSpec((1, H, S, D), lambda b, w: (b, 0, 0, 0))
    kernel = functools.partial(_linformer_kernel, mxu_dtype=mxu_dtype)

    return pl.pallas_call(
        kernel,
        out_shape=jax.ShapeDtypeStruct((B, H, S, D), jnp.float32),
        grid_spec=pltpu.PrefetchScalarGridSpec(
            num_scalar_prefetch=1,              # conv weights -> SMEM
            grid=(B,),                          # one step per batch; heads batched inside
            in_specs=[
                bhsd,                                               # Q
                bhsd,                                               # K
                bhsd,                                               # V
                pl.BlockSpec((1, S, 1), lambda b, w: (b, 0, 0)),    # mask
                pl.BlockSpec((H, Lk, S), lambda b, w: (0, 0, 0)),   # E (fetched once)
            ],
            out_specs=bhsd,
        ),
        compiler_params=pltpu.CompilerParams(
            dimension_semantics=("parallel",),        # shards across v7x TensorCores
            vmem_limit_bytes=32 * 1024 * 1024,        # explicit budget (<= v7x scoped max)
        ),
    )(conv_w.astype(jnp.float32), Q, K, V, mask3, E.astype(jnp.float32))


def reference_forward(Q, K, V, mask, E, conv_w):
    """Pure-JAX reference mirroring the PyTorch module (n_sparse=0)."""
    B, H, S, D = Q.shape
    KH = conv_w.shape[1]
    m = mask[:, None, :, None]
    Km = K * m
    Vm = V * m
    Kp = jnp.einsum('hks,bhsd->bhkd', E, Km)
    Vp = jnp.einsum('hks,bhsd->bhkd', E, Vm)
    dot = jnp.einsum('bhsd,bhkd->bhsk', Q, Kp) / math.sqrt(D)
    attn = jax.nn.softmax(dot, axis=-1)
    dot1 = jnp.einsum('bhsd,bhse->bhde', Q, Km) / math.sqrt(S)
    attn1 = jax.nn.softmax(dot1, axis=-1)
    X = jnp.einsum('bhsk,bhkd->bhsd', attn, Vp) + jnp.einsum('bhsd,bhde->bhse', Vm, attn1)
    pad = KH // 2
    Vpad = jnp.pad(Vm, ((0, 0), (0, 0), (pad, pad), (0, 0)))
    conv = jnp.zeros_like(X)
    for j in range(KH):
        conv = conv + conv_w[None, :, None, j:j + 1] * Vpad[:, :, j:j + S, :]
    return X + conv


if __name__ == "__main__":
    # Small config consistent with the module: num_head=2, head_dim=32,
    # max_seq_len=16, linformer_k=8, conv_kernel_size=3, n_sparse=0.
    B, H, S, D, LK, KH = 2, 2, 16, 32, 8, 3

    key = jax.random.PRNGKey(0)
    kq, kk, kv, km, ke, kw = jax.random.split(key, 6)

    Q = jax.random.normal(kq, (B, H, S, D), dtype=jnp.float32)
    K = jax.random.normal(kk, (B, H, S, D), dtype=jnp.float32)
    V = jax.random.normal(kv, (B, H, S, D), dtype=jnp.float32)
    mask = (jax.random.uniform(km, (B, S)) > 0.3).astype(jnp.float32)

    # Deterministic parameter init (shapes per __init__):
    #   E ~ Normal(0, 0.02) of shape (num_head, linformer_k, seq_len)
    #   conv: grouped Conv2d weight (H, 1, KH, 1) -> stored as (H, KH)
    E = 0.02 * jax.random.normal(ke, (H, LK, S), dtype=jnp.float32)
    conv_w = 0.1 * jax.random.normal(kw, (H, KH), dtype=jnp.float32)

    out = linformer_attention(Q, K, V, mask, E, conv_w)
    out = jax.block_until_ready(out)

    ref = reference_forward(Q, K, V, mask, E, conv_w)
    assert out.shape == (B, H, S, D)
    assert jnp.allclose(out, ref, atol=1e-4, rtol=1e-4), "mismatch vs reference"

    print("KERNEL_OK")
</pallas_src>

<mosaic_0001>
module attributes {stable_mosaic.version = 11 : i64} {
  func.func @_linformer_kernel(%arg0: i32, %arg1: memref<2x3xf32, #tpu.memory_space<smem>>, %arg2: memref<1x2x16x32xf32, #tpu.memory_space<vmem>>, %arg3: memref<1x2x16x32xf32, #tpu.memory_space<vmem>>, %arg4: memref<1x2x16x32xf32, #tpu.memory_space<vmem>>, %arg5: memref<1x16x1xf32, #tpu.memory_space<vmem>>, %arg6: memref<2x8x16xf32, #tpu.memory_space<vmem>>, %arg7: memref<1x2x16x32xf32, #tpu.memory_space<vmem>>) attributes {dimension_semantics = [#tpu.dimension_semantics<parallel>], iteration_bounds = array<i64: 2>, scalar_prefetch = 1 : i64, scratch_operands = 0 : i64, tpu.core_type = #tpu.core_type<tc>, window_params = [{transform_indices = @transform_0, window_bounds = array<i64: 1, 2, 16, 32>}, {transform_indices = @transform_1, window_bounds = array<i64: 1, 2, 16, 32>}, {transform_indices = @transform_2, window_bounds = array<i64: 1, 2, 16, 32>}, {transform_indices = @transform_3, window_bounds = array<i64: 1, 16, 1>}, {pipeline_mode = #tpu.pipeline_mode<synchronous>, transform_indices = @transform_4, window_bounds = array<i64: 2, 8, 16>}, {transform_indices = @transform_5, window_bounds = array<i64: 1, 2, 16, 32>}]} {
    %c0 = arith.constant 0 : index
    %c0_0 = arith.constant 0 : index
    %c0_1 = arith.constant 0 : index
    %c0_2 = arith.constant 0 : index
    %0 = vector.load %arg2[%c0, %c0_0, %c0_1, %c0_2] : memref<1x2x16x32xf32, #tpu.memory_space<vmem>>, vector<1x2x16x32xf32>
    %1 = vector.shape_cast %0 : vector<1x2x16x32xf32> to vector<2x16x32xf32>
    %c0_3 = arith.constant 0 : index
    %c0_4 = arith.constant 0 : index
    %c0_5 = arith.constant 0 : index
    %c0_6 = arith.constant 0 : index
    %2 = vector.load %arg3[%c0_3, %c0_4, %c0_5, %c0_6] : memref<1x2x16x32xf32, #tpu.memory_space<vmem>>, vector<1x2x16x32xf32>
    %3 = vector.shape_cast %2 : vector<1x2x16x32xf32> to vector<2x16x32xf32>
    %c0_7 = arith.constant 0 : index
    %c0_8 = arith.constant 0 : index
    %c0_9 = arith.constant 0 : index
    %c0_10 = arith.constant 0 : index
    %4 = vector.load %arg4[%c0_7, %c0_8, %c0_9, %c0_10] : memref<1x2x16x32xf32, #tpu.memory_space<vmem>>, vector<1x2x16x32xf32>
    %5 = vector.shape_cast %4 : vector<1x2x16x32xf32> to vector<2x16x32xf32>
    %c0_11 = arith.constant 0 : index
    %c0_12 = arith.constant 0 : index
    %c0_13 = arith.constant 0 : index
    %6 = vector.load %arg5[%c0_11, %c0_12, %c0_13] : memref<1x16x1xf32, #tpu.memory_space<vmem>>, vector<1x16x1xf32>
    %7 = vector.shape_cast %6 : vector<1x16x1xf32> to vector<16x1xf32>
    %c0_14 = arith.constant 0 : index
    %c0_15 = arith.constant 0 : index
    %c0_16 = arith.constant 0 : index
    %8 = vector.load %arg6[%c0_14, %c0_15, %c0_16] : memref<2x8x16xf32, #tpu.memory_space<vmem>>, vector<2x8x16xf32>
    %9 = vector.shape_cast %7 : vector<16x1xf32> to vector<1x16x1xf32>
    %10 = vector.broadcast %9 : vector<1x16x1xf32> to vector<2x16x32xf32>
    %11 = arith.mulf %3, %10 : vector<2x16x32xf32>
    %12 = vector.shape_cast %7 : vector<16x1xf32> to vector<1x16x1xf32>
    %13 = vector.broadcast %12 : vector<1x16x1xf32> to vector<2x16x32xf32>
    %14 = arith.mulf %5, %13 : vector<2x16x32xf32>
    "tpu.trace_start"() <{level = 10 : i32, message = "hks,hsd->hkd"}> : () -> ()
    %cst = arith.constant dense<0.000000e+00> : vector<2x8x32xf32>
    %15 = tpu.matmul %8, %11, %cst {dimension_numbers = #tpu.dot_dimension_numbers<[2], [1], [1], [2], [0, 0, 0, 1, 1, 2], [0], [0]>} : vector<2x8x16xf32>, vector<2x16x32xf32>, vector<2x8x32xf32> -> vector<2x8x32xf32>
    %cst_17 = arith.constant dense<0.000000e+00> : vector<2x8x32xf32>
    %16 = tpu.matmul %8, %14, %cst_17 {dimension_numbers = #tpu.dot_dimension_numbers<[2], [1], [1], [2], [0, 0, 0, 1, 1, 2], [0], [0]>} : vector<2x8x16xf32>, vector<2x16x32xf32>, vector<2x8x32xf32> -> vector<2x8x32xf32>
    "tpu.trace_stop"() : () -> ()
    "tpu.trace_start"() <{level = 10 : i32, message = "hsd,hkd->hsk"}> : () -> ()
    %cst_18 = arith.constant dense<0.000000e+00> : vector<2x16x8xf32>
    %17 = tpu.matmul %1, %15, %cst_18 {dimension_numbers = #tpu.dot_dimension_numbers<[2], [2], [1], [1], [0, 0, 0, 1, 1, 1], [0], [0]>} : vector<2x16x32xf32>, vector<2x8x32xf32>, vector<2x16x8xf32> -> vector<2x16x8xf32>
    "tpu.trace_stop"() : () -> ()
    %cst_19 = arith.constant 0.176776692 : f32
    %18 = vector.broadcast %cst_19 : f32 to vector<2x16x8xf32>
    %19 = arith.mulf %17, %18 : vector<2x16x8xf32>
    %cst_20 = arith.constant dense<0xFF800000> : vector<2x16xf32>
    %20 = vector.multi_reduction <maximumf>, %19, %cst_20 [2] : vector<2x16x8xf32> to vector<2x16xf32>
    %21 = vector.shape_cast %20 : vector<2x16xf32> to vector<2x16x1xf32>
    %22 = vector.broadcast %21 : vector<2x16x1xf32> to vector<2x16x8xf32>
    %23 = arith.subf %19, %22 : vector<2x16x8xf32>
    %24 = math.exp %23 : vector<2x16x8xf32>
    %cst_21 = arith.constant dense<0.000000e+00> : vector<2x16xf32>
    %25 = vector.multi_reduction <add>, %24, %cst_21 [2] : vector<2x16x8xf32> to vector<2x16xf32>
    %26 = vector.shape_cast %25 : vector<2x16xf32> to vector<2x16x1xf32>
    %27 = tpu.reciprocal %26 : vector<2x16x1xf32> -> vector<2x16x1xf32>
    %28 = vector.broadcast %27 : vector<2x16x1xf32> to vector<2x16x8xf32>
    %29 = arith.mulf %24, %28 : vector<2x16x8xf32>
    "tpu.trace_start"() <{level = 10 : i32, message = "hsk,hkd->hsd"}> : () -> ()
    %cst_22 = arith.constant dense<0.000000e+00> : vector<2x16x32xf32>
    %30 = tpu.matmul %29, %16, %cst_22 {dimension_numbers = #tpu.dot_dimension_numbers<[2], [1], [1], [2], [0, 0, 0, 1, 1, 2], [0], [0]>} : vector<2x16x8xf32>, vector<2x8x32xf32>, vector<2x16x32xf32> -> vector<2x16x32xf32>
    "tpu.trace_stop"() : () -> ()
    "tpu.trace_start"() <{level = 10 : i32, message = "hsd,hse->hde"}> : () -> ()
    %cst_23 = arith.constant dense<0.000000e+00> : vector<2x32x32xf32>
    %31 = tpu.matmul %1, %11, %cst_23 {dimension_numbers = #tpu.dot_dimension_numbers<[1], [1], [2], [2], [0, 0, 0, 2, 1, 2], [0], [0]>} : vector<2x16x32xf32>, vector<2x16x32xf32>, vector<2x32x32xf32> -> vector<2x32x32xf32>
    "tpu.trace_stop"() : () -> ()
    %cst_24 = arith.constant 2.500000e-01 : f32
    %32 = vector.broadcast %cst_24 : f32 to vector<2x32x32xf32>
    %33 = arith.mulf %31, %32 : vector<2x32x32xf32>
    %cst_25 = arith.constant dense<0xFF800000> : vector<2x32xf32>
    %34 = vector.multi_reduction <maximumf>, %33, %cst_25 [2] : vector<2x32x32xf32> to vector<2x32xf32>
    %35 = vector.shape_cast %34 : vector<2x32xf32> to vector<2x32x1xf32>
    %36 = vector.broadcast %35 : vector<2x32x1xf32> to vector<2x32x32xf32>
    %37 = arith.subf %33, %36 : vector<2x32x32xf32>
    %38 = math.exp %37 : vector<2x32x32xf32>
    %cst_26 = arith.constant dense<0.000000e+00> : vector<2x32xf32>
    %39 = vector.multi_reduction <add>, %38, %cst_26 [2] : vector<2x32x32xf32> to vector<2x32xf32>
    %40 = vector.shape_cast %39 : vector<2x32xf32> to vector<2x32x1xf32>
    %41 = tpu.reciprocal %40 : vector<2x32x1xf32> -> vector<2x32x1xf32>
    %42 = vector.broadcast %41 : vector<2x32x1xf32> to vector<2x32x32xf32>
    %43 = arith.mulf %38, %42 : vector<2x32x32xf32>
    "tpu.trace_start"() <{level = 10 : i32, message = "hsd,hde->hse"}> : () -> ()
    %cst_27 = arith.constant dense<0.000000e+00> : vector<2x16x32xf32>
    %44 = tpu.matmul %14, %43, %cst_27 {dimension_numbers = #tpu.dot_dimension_numbers<[2], [1], [1], [2], [0, 0, 0, 1, 1, 2], [0], [0]>} : vector<2x16x32xf32>, vector<2x32x32xf32>, vector<2x16x32xf32> -> vector<2x16x32xf32>
    "tpu.trace_stop"() : () -> ()
    %45 = arith.addf %30, %44 : vector<2x16x32xf32>
    %46 = tpu.iota {dimensions = array<i32: 0>} : vector<16x1xi32>
    %c1_i32 = arith.constant 1 : i32
    %47 = tpu.dynamic_rotate %14 by %c1_i32 dim 1 : vector<2x16x32xf32>, i32 -> vector<2x16x32xf32>
    %c1_i32_28 = arith.constant 1 : i32
    %48 = vector.broadcast %c1_i32_28 : i32 to vector<16x1xi32>
    %49 = arith.cmpi sge, %46, %48 : vector<16x1xi32>
    %c16_i32 = arith.constant 16 : i32
    %50 = vector.broadcast %c16_i32 : i32 to vector<16x1xi32>
    %51 = arith.cmpi slt, %46, %50 : vector<16x1xi32>
    %52 = arith.andi %49, %51 : vector<16x1xi1>
    %53 = vector.shape_cast %52 : vector<16x1xi1> to vector<1x16x1xi1>
    %cst_29 = arith.constant 0.000000e+00 : f32
    %54 = vector.shape_cast %53 : vector<1x16x1xi1> to vector<1x16x1xi1>
    %55 = vector.broadcast %54 : vector<1x16x1xi1> to vector<2x16x32xi1>
    %56 = vector.broadcast %cst_29 : f32 to vector<2x16x32xf32>
    %57 = arith.select %55, %47, %56 : vector<2x16x32xi1>, vector<2x16x32xf32>
    %c15_i32 = arith.constant 15 : i32
    %58 = tpu.dynamic_rotate %14 by %c15_i32 dim 1 : vector<2x16x32xf32>, i32 -> vector<2x16x32xf32>
    %c0_i32 = arith.constant 0 : i32
    %59 = vector.broadcast %c0_i32 : i32 to vector<16x1xi32>
    %60 = arith.cmpi sge, %46, %59 : vector<16x1xi32>
    %c15_i32_30 = arith.constant 15 : i32
    %61 = vector.broadcast %c15_i32_30 : i32 to vector<16x1xi32>
    %62 = arith.cmpi slt, %46, %61 : vector<16x1xi32>
    %63 = arith.andi %60, %62 : vector<16x1xi1>
    %64 = vector.shape_cast %63 : vector<16x1xi1> to vector<1x16x1xi1>
    %cst_31 = arith.constant 0.000000e+00 : f32
    %65 = vector.shape_cast %64 : vector<1x16x1xi1> to vector<1x16x1xi1>
    %66 = vector.broadcast %65 : vector<1x16x1xi1> to vector<2x16x32xi1>
    %67 = vector.broadcast %cst_31 : f32 to vector<2x16x32xf32>
    %68 = arith.select %66, %58, %67 : vector<2x16x32xi1>, vector<2x16x32xf32>
    %69 = vector.extract_strided_slice %57 {offsets = [0, 0, 0], sizes = [1, 16, 32], strides = [1, 1, 1]} : vector<2x16x32xf32> to vector<1x16x32xf32>
    %70 = vector.shape_cast %69 : vector<1x16x32xf32> to vector<16x32xf32>
    %c0_32 = arith.constant 0 : index
    %c0_33 = arith.constant 0 : index
    %71 = memref.load %arg1[%c0_32, %c0_33] : memref<2x3xf32, #tpu.memory_space<smem>>
    %72 = vector.broadcast %71 : f32 to vector<16x32xf32>
    %73 = arith.mulf %70, %72 : vector<16x32xf32>
    %74 = vector.extract_strided_slice %14 {offsets = [0, 0, 0], sizes = [1, 16, 32], strides = [1, 1, 1]} : vector<2x16x32xf32> to vector<1x16x32xf32>
    %75 = vector.shape_cast %74 : vector<1x16x32xf32> to vector<16x32xf32>
    %c0_34 = arith.constant 0 : index
    %c1 = arith.constant 1 : index
    %76 = memref.load %arg1[%c0_34, %c1] : memref<2x3xf32, #tpu.memory_space<smem>>
    %77 = vector.broadcast %76 : f32 to vector<16x32xf32>
    %78 = arith.mulf %75, %77 : vector<16x32xf32>
    %79 = arith.addf %73, %78 : vector<16x32xf32>
    %80 = vector.extract_strided_slice %68 {offsets = [0, 0, 0], sizes = [1, 16, 32], strides = [1, 1, 1]} : vector<2x16x32xf32> to vector<1x16x32xf32>
    %81 = vector.shape_cast %80 : vector<1x16x32xf32> to vector<16x32xf32>
    %c0_35 = arith.constant 0 : index
    %c2 = arith.constant 2 : index
    %82 = memref.load %arg1[%c0_35, %c2] : memref<2x3xf32, #tpu.memory_space<smem>>
    %83 = vector.broadcast %82 : f32 to vector<16x32xf32>
    %84 = arith.mulf %81, %83 : vector<16x32xf32>
    %85 = arith.addf %79, %84 : vector<16x32xf32>
    %86 = vector.extract_strided_slice %57 {offsets = [1, 0, 0], sizes = [1, 16, 32], strides = [1, 1, 1]} : vector<2x16x32xf32> to vector<1x16x32xf32>
    %87 = vector.shape_cast %86 : vector<1x16x32xf32> to vector<16x32xf32>
    %c1_36 = arith.constant 1 : index
    %c0_37 = arith.constant 0 : index
    %88 = memref.load %arg1[%c1_36, %c0_37] : memref<2x3xf32, #tpu.memory_space<smem>>
    %89 = vector.broadcast %88 : f32 to vector<16x32xf32>
    %90 = arith.mulf %87, %89 : vector<16x32xf32>
    %91 = vector.extract_strided_slice %14 {offsets = [1, 0, 0], sizes = [1, 16, 32], strides = [1, 1, 1]} : vector<2x16x32xf32> to vector<1x16x32xf32>
    %92 = vector.shape_cast %91 : vector<1x16x32xf32> to vector<16x32xf32>
    %c1_38 = arith.constant 1 : index
    %c1_39 = arith.constant 1 : index
    %93 = memref.load %arg1[%c1_38, %c1_39] : memref<2x3xf32, #tpu.memory_space<smem>>
    %94 = vector.broadcast %93 : f32 to vector<16x32xf32>
    %95 = arith.mulf %92, %94 : vector<16x32xf32>
    %96 = arith.addf %90, %95 : vector<16x32xf32>
    %97 = vector.extract_strided_slice %68 {offsets = [1, 0, 0], sizes = [1, 16, 32], strides = [1, 1, 1]} : vector<2x16x32xf32> to vector<1x16x32xf32>
    %98 = vector.shape_cast %97 : vector<1x16x32xf32> to vector<16x32xf32>
    %c1_40 = arith.constant 1 : index
    %c2_41 = arith.constant 2 : index
    %99 = memref.load %arg1[%c1_40, %c2_41] : memref<2x3xf32, #tpu.memory_space<smem>>
    %100 = vector.broadcast %99 : f32 to vector<16x32xf32>
    %101 = arith.mulf %98, %100 : vector<16x32xf32>
    %102 = arith.addf %96, %101 : vector<16x32xf32>
    %103 = vector.shape_cast %85 : vector<16x32xf32> to vector<1x16x32xf32>
    %104 = vector.shape_cast %102 : vector<16x32xf32> to vector<1x16x32xf32>
    %105 = tpu.concatenate %103, %104 in 0 : vector<1x16x32xf32>, vector<1x16x32xf32> -> vector<2x16x32xf32>
    %106 = arith.addf %45, %105 : vector<2x16x32xf32>
    %c0_42 = arith.constant 0 : index
    %c0_43 = arith.constant 0 : index
    %c0_44 = arith.constant 0 : index
    %c0_45 = arith.constant 0 : index
    %107 = vector.load %arg7[%c0_42, %c0_43, %c0_44, %c0_45] : memref<1x2x16x32xf32, #tpu.memory_space<vmem>>, vector<1x2x16x32xf32>
    %108 = vector.shape_cast %107 : vector<1x2x16x32xf32> to vector<2x16x32xf32>
    %109 = vector.shape_cast %106 : vector<2x16x32xf32> to vector<1x2x16x32xf32>
    tpu.vector_store %arg7[%c0_42, %c0_43, %c0_44, %c0_45], %109 {strides = array<i32>} : memref<1x2x16x32xf32, #tpu.memory_space<vmem>>, vector<1x2x16x32xf32>,
    return
  }
  func.func @transform_0(%arg0: i32, %arg1: memref<2x3xf32, #tpu.memory_space<smem>>) -> (i32, i32, i32, i32) {
    %c0_i32 = arith.constant 0 : i32
    %c0_i32_0 = arith.constant 0 : i32
    %c0_i32_1 = arith.constant 0 : i32
    %c0_i32_2 = arith.constant 0 : i32
    return %arg0, %c0_i32, %c0_i32_0, %c0_i32_1 : i32, i32, i32, i32
  }
  func.func @transform_1(%arg0: i32, %arg1: memref<2x3xf32, #tpu.memory_space<smem>>) -> (i32, i32, i32, i32) {
    %c0_i32 = arith.constant 0 : i32
    %c0_i32_0 = arith.constant 0 : i32
    %c0_i32_1 = arith.constant 0 : i32
    %c0_i32_2 = arith.constant 0 : i32
    return %arg0, %c0_i32, %c0_i32_0, %c0_i32_1 : i32, i32, i32, i32
  }
  func.func @transform_2(%arg0: i32, %arg1: memref<2x3xf32, #tpu.memory_space<smem>>) -> (i32, i32, i32, i32) {
    %c0_i32 = arith.constant 0 : i32
    %c0_i32_0 = arith.constant 0 : i32
    %c0_i32_1 = arith.constant 0 : i32
    %c0_i32_2 = arith.constant 0 : i32
    return %arg0, %c0_i32, %c0_i32_0, %c0_i32_1 : i32, i32, i32, i32
  }
  func.func @transform_3(%arg0: i32, %arg1: memref<2x3xf32, #tpu.memory_space<smem>>) -> (i32, i32, i32) {
    %c0_i32 = arith.constant 0 : i32
    %c0_i32_0 = arith.constant 0 : i32
    %c0_i32_1 = arith.constant 0 : i32
    return %arg0, %c0_i32, %c0_i32_0 : i32, i32, i32
  }
  func.func @transform_4(%arg0: i32, %arg1: memref<2x3xf32, #tpu.memory_space<smem>>) -> (i32, i32, i32) {
    %c0_i32 = arith.constant 0 : i32
    %c0_i32_0 = arith.constant 0 : i32
    %c0_i32_1 = arith.constant 0 : i32
    %c0_i32_2 = arith.constant 0 : i32
    return %c0_i32, %c0_i32_0, %c0_i32_1 : i32, i32, i32
  }
  func.func @transform_5(%arg0: i32, %arg1: memref<2x3xf32, #tpu.memory_space<smem>>) -> (i32, i32, i32, i32) {
    %c0_i32 = arith.constant 0 : i32
    %c0_i32_0 = arith.constant 0 : i32
    %c0_i32_1 = arith.constant 0 : i32
    %c0_i32_2 = arith.constant 0 : i32
    return %arg0, %c0_i32, %c0_i32_0, %c0_i32_1 : i32, i32, i32, i32
  }
}

</mosaic_0001>

<bundles_post_ra>
// kernel: tpu_custom_call.1
= control target key start
LH: loop header
LB: loop body
LE: loop exit
PB: predicated region body
PF: predicated region fallthrough
CT: control target
= control target key end

     0   :  { %s2849_s0 = inlined_call_operand.vmem [shape: f32[2,3], index: 0, kind: input, shape index: {}]   ;;  %s2850_s1 = inlined_call_operand.hbm [shape: f32[2,2,16,32], index: 1, kind: input, shape index: {}]   ;;  %s2851_s2 = inlined_call_operand.hbm [shape: f32[2,2,16,32], index: 2, kind: input, shape index: {}]   ;;  %s2852_s3 = inlined_call_operand.hbm [shape: f32[2,2,16,32], index: 3, kind: input, shape index: {}]   ;;  %s2853_s4 = inlined_call_operand.vmem [shape: f32[2,16,1], index: 4, kind: input, shape index: {}]   ;;  %s2854_s5 = inlined_call_operand.vmem [shape: f32[2,8,16], index: 5, kind: input, shape index: {}]   ;;  %s2855_s6 = inlined_call_operand.hbm [shape: f32[2,2,16,32], index: 6, kind: output, shape index: {}]  }
   0x1   :  { %2863 = sst [smem:[#allocation16_spill]] %s2850_s1  ;;  %s11_s23 = sshll.u32 %s2849_s0, 4  ;;  %s12_s23 = int_to_ptr.vmem [resolvable:$true] %s11_s23 }
   0x2   :  { %2864 = sst [smem:[#allocation17_spill]] %s2851_s2  ;;  %s2147_s24 = scalar_lea.vmem %s12_s23, 32 }
   0x3   :  { %p2148_p0 = scmp.ne.s32.totalorder %s12_s23, %s2147_s24  ;;  %p2152_p1 = scmp.lt.s32.totalorder %s12_s23, %s12_s23 }
   0x4   :  { %p2153_p2 = scmp.lt.s32.totalorder %s2147_s24, %s2147_s24 }
   0x6   :  { %p2154_p3 = por %p2153_p2, %p2152_p1 }
   0x8   :  { %p2155_p4 = pnand %p2154_p3, %p2148_p0 }
   0xa   :  { %2158 = shalt.err (!%p2155_p4)  }
   0xb   :  { %s2323_s25 = smov [#allocation3]  }
   0xc   :  { %14 = dma.vmem_to_smem %s12_s23, 32, %s2323_s25, [#allocation2] }
   0xd   :  { %2293 = dma.done.wait [#allocation2], 32 }
   0xe   :  { %2294 = vsyncadd [#allocation2], 4294967264 }
   0xf   :  { %16 = sfence }
  0x10   :  { %17 = vsyncpa [#allocation5], 0 }
  0x11   :  { %19 = vsyncpa [#allocation5 + $0x1], 0 }
  0x12   :  { %20 = vsyncpa [#allocation8], 0 }
  0x13   :  { %22 = vsyncpa [#allocation8 + $0x1], 0 }
  0x14   :  { %23 = vsyncpa [#allocation6], 0 }
  0x15   :  { %25 = vsyncpa [#allocation6 + $0x1], 0  ;;  %s2374_s0 = smov 0   ;;  %s2376_s26 = smov 0  }
  0x16   :  { %s2378_s27 = smov 0   ;;  %s2380_s28 = smov 0  }
  0x17 LB: > { %s2395_s29 = sadd.s32 4294967295, %s2321_s28   ;;  %s1795_s30 = sadd.s32 4294967294, %s2321_s28   ;;  %s2321_s28 = sphi %s2380_s28, %s2887_s28   ;;  %s2317_s27 = sphi %s2378_s27, %s2886_s27   ;;  %s2313_s26 = sphi %s2376_s26, %s2885_s26   ;;  %s2309_s0 = sphi %s2374_s0, %s2884_s0  }
  0x18   : > { %s2399_s7 = sadd.s32 1, %s2321_s28   ;;  %s38_s8 = sadd.s32 1, %s2317_s27 }
  0x19   : > { %s35_s9 = ssub.s32 %s2321_s28, %s2399_s7  ;;  %p45_p5 = scmp.ne.s32.totalorder %s2317_s27, %s2313_s26 }
  0x1a   : > { %p36_p6 = scmp.eq.s32.totalorder %s35_s9, 0  ;;  %p46_p7 = scmp.eq.s32.totalorder %s2321_s28, 0 }
  0x1b   : > { %p51_p8 = scmp.ne.s32.totalorder %s2313_s26, %s2309_s0  ;;  %p52_p9 = scmp.eq.s32.totalorder %s2395_s29, 0 }
  0x1c   : > { %s2411_s10 = scalar_select %p36_p6, %s2317_s27, %s38_s8  }
  0x1d   : > { %p47_p10 = por %p46_p7, %p45_p5  ;;  %p2413_p11 = por %p52_p9, %p51_p8 }
  0x1e   : > { %2865 = sst [smem:[#allocation15_spill]] %s2411_s10  ;;  %p174_p12 = scmp.eq.s32.totalorder %s2395_s29, 1 }
  0x1f   : > { %s2866_s11 = scalar_select %p2413_p11, 1, 0 }
  0x20   : > { %p180_p13 = scmp.eq.s32.totalorder %s1795_s30, 1  ;;  %p2055_p1 = scmp.lt.s32.totalorder %s2321_s28, 2 }
  0x21   : > { %p2420_p2 = por %p174_p12, %p45_p5  ;;  %s2858_s14 = sand.u32 1, %s2317_s27  }
  0x22   : > { %p2424_p3 = por %p180_p13, %p51_p8  ;;  %s2430_s15 = sshll.u32 %s2321_s28, 9 }
  0x23   : > { %s2867_s12 = scalar_select %p2420_p2, 1, 0 }
  0x24   : > { %s2868_s13 = scalar_select %p2424_p3, 1, 0 }
  0x25   : > { %s2434_s16 = sshll.u32 %s2858_s14, 5  ;;  %p2436_p4 = pnand %p2055_p1, %p47_p10 }
  0x26   : > { %s224_s18 = sand.u32 1, %s2321_s28   ;;  %s2870_s2 = sld [smem:[#allocation17_spill]] }
  0x27   : > { %s228_s22 = scalar_lea.vmem [#allocation7], %s2434_s16  ;;  %s2451_s24 = scalar_lea.sflag [#allocation8], %s224_s18 }
  0x28   : > { %s235_s23 = sshll.u32 %s228_s22, 4  ;;  %p2457_p7 = pneg %p2436_p4  ;;  %s2448_s23 = int_to_ptr.vmem [resolvable:$true] %s235_s23 }
  0x2c   : > { %s2445_s21 = scalar_lea.hbm %s2870_s2, %s2430_s15  ;;  %s2164_s19 = scalar_lea.hbm %s2870_s2, 1024 }
  0x2d   : > { %s2159_s25 = scalar_lea.hbm %s2445_s21, 512  ;;  %p2165_p10 = scmp.lt.u32.totalorder %s2445_s21, %s2870_s2 }
  0x2e   : > { %p2160_p6 = scmp.ne.s32.totalorder %s2445_s21, %s2159_s25  ;;  %p2166_p12 = scmp.lt.u32.totalorder %s2164_s19, %s2159_s25 }
  0x2f   : > { %p2168_p1 = scmp.lt.u32.totalorder %s2159_s25, %s2445_s21 }
  0x30   : > { %p2162_p8 = pnand %p2457_p7, %p2160_p6  ;;  %p2167_p13 = por %p2166_p12, %p2165_p10 }
  0x32   : > { %p2163_p9 = pneg %p2162_p8  ;;  %p2169_p0 = por %p2168_p1, %p2167_p13 }
  0x34   : > { %p2170_p5 = pnand %p2169_p0, %p2163_p9 }
  0x36   : > { %2173 = shalt.err (!%p2170_p5)
}
  0x37   : > { %s2174_s18 = scalar_lea.vmem %s2448_s23, 512  ;;  %s2324_s8 = smov [#allocation7]  }
  0x38   : > { %p2175_p6 = scmp.ne.s32.totalorder %s2448_s23, %s2174_s18  ;;  %s2179_s9 = sshll.u32 %s2324_s8, 4  ;;  %s2180_s9 = int_to_ptr.vmem [resolvable:$false] %s2179_s9 }
  0x39   : > { %s2181_s20 = scalar_lea.vmem %s2180_s9, 1024  ;;  %p2182_p2 = scmp.lt.s32.totalorder %s2448_s23, %s2180_s9 }
  0x3a   : > { %p2177_p8 = pnand %p2175_p6, %p2457_p7  ;;  %p2183_p11 = scmp.lt.s32.totalorder %s2181_s20, %s2174_s18 }
  0x3c   : > { %p2178_p3 = pneg %p2177_p8  ;;  %p2184_p10 = por %p2183_p11, %p2182_p2 }
  0x3e   : > { %p2185_p12 = pnand %p2184_p10, %p2178_p3 }
  0x40   : > { %2188 = shalt.err (!%p2185_p12)
}
  0x41   : > { %s2859_s25 = smov 128   ;;  %s2861_s19 = smov 8  }
  0x42   : > { %2047 = dma.hbm_to_vmem [thread:$0]  (!%p2436_p4), %s2445_s21, 512, %s2448_s23, %s2451_s24, %s2859_s25, %s2859_s25, %s2861_s19  }
  0x43   : > { %p272_p11 = scmp.lt.s32.totalorder %s2321_s28, 3  ;;  %s2872_s1 = sld [smem:[#allocation16_spill]] }
  0x44   : > { %p2873_p0 = scmp.ge.s32.totalorder %s2321_s28, 1  ;;  %s207_s20 = scalar_lea.vmem [#allocation4], %s2434_s16 }
  0x45   : > { %s214_s14 = sshll.u32 %s207_s20, 4  ;;  %s2875_s21 = sand.u32 1, %s2317_s27   ;;  %s2498_s14 = int_to_ptr.vmem [resolvable:$true] %s214_s14 }
  0x46   : > { %p2493_p2 = pnand %p2873_p0, %p272_p11  ;;  %s2502_s23 = scalar_lea.sflag [#allocation5], %s2875_s21 }
  0x48   : > { %s2874_s9 = scalar_select %p2493_p2, 1, 0 }
  0x49   : > { %s2489_s8 = scalar_lea.hbm %s2872_s1, %s2430_s15  ;;  %s2194_s19 = scalar_lea.hbm %s2872_s1, 1024 }
  0x4a   : > { %s2189_s25 = scalar_lea.hbm %s2489_s8, 512  ;;  %p2195_p13 = scmp.lt.u32.totalorder %s2489_s8, %s2872_s1 }
  0x4b   : > { %p2190_p3 = scmp.ne.s32.totalorder %s2489_s8, %s2189_s25  ;;  %p2196_p1 = scmp.lt.u32.totalorder %s2194_s19, %s2189_s25 }
  0x4c   : > { %p2198_p8 = scmp.lt.u32.totalorder %s2189_s25, %s2489_s8 }
  0x4d   : > { %p2192_p5 = pnand %p2190_p3, %p2457_p7  ;;  %p2197_p6 = por %p2196_p1, %p2195_p13 }
  0x4f   : > { %p2193_p9 = pneg %p2192_p5  ;;  %p2199_p10 = por %p2198_p8, %p2197_p6 }
  0x51   : > { %p2200_p12 = pnand %p2199_p10, %p2193_p9 }
  0x53   : > { %2203 = shalt.err (!%p2200_p12)
}
  0x54   : > { %s2204_s20 = scalar_lea.vmem %s2498_s14, 512  ;;  %s2327_s21 = smov [#allocation4]  }
  0x55   : > { %p2205_p11 = scmp.ne.s32.totalorder %s2498_s14, %s2204_s20  ;;  %s2209_s22 = sshll.u32 %s2327_s21, 4  ;;  %s2210_s22 = int_to_ptr.vmem [resolvable:$false] %s2209_s22 }
  0x56   : > { %s2211_s2 = scalar_lea.vmem %s2210_s22, 1024  ;;  %p2212_p5 = scmp.lt.s32.totalorder %s2498_s14, %s2210_s22 }
  0x57   : > { %p2207_p0 = pnand %p2205_p11, %p2457_p7  ;;  %p2213_p2 = scmp.lt.s32.totalorder %s2211_s2, %s2204_s20 }
  0x59   : > { %p2208_p3 = pneg %p2207_p0  ;;  %p2214_p13 = por %p2213_p2, %p2212_p5 }
  0x5b   : > { %p2215_p1 = pnand %p2214_p13, %p2208_p3 }
  0x5d   : > { %2218 = shalt.err (!%p2215_p1)
}
  0x5e   : > { %s2876_s10 = smov 8   ;;  %s2877_s25 = smov 128  }
  0x5f   : > { %2044 = dma.hbm_to_vmem [thread:$0]  (!%p2436_p4), %s2489_s8, 512, %s2498_s14, %s2502_s23, %s2877_s25, %s2877_s25, %s2876_s10  }
  0x60   : > { %s2533_s21 = scalar_lea.hbm %s2852_s3, %s2430_s15  ;;  %s249_s20 = scalar_lea.vmem [#allocation9], %s2434_s16 }
  0x61   : > { %s256_s22 = sshll.u32 %s249_s20, 4  ;;  %s2219_s2 = scalar_lea.hbm %s2533_s21, 512  ;;  %s2536_s22 = int_to_ptr.vmem [resolvable:$true] %s256_s22 }
  0x62   : > { %p2220_p2 = scmp.ne.s32.totalorder %s2533_s21, %s2219_s2  ;;  %s2224_s8 = scalar_lea.hbm %s2852_s3, 1024 }
  0x63   : > { %p2225_p8 = scmp.lt.u32.totalorder %s2533_s21, %s2852_s3  ;;  %p2226_p10 = scmp.lt.u32.totalorder %s2224_s8, %s2219_s2 }
  0x64   : > { %p2222_p9 = pnand %p2220_p2, %p2457_p7  ;;  %p2228_p11 = scmp.lt.u32.totalorder %s2219_s2, %s2533_s21 }
  0x65   : > { %p2227_p12 = por %p2226_p10, %p2225_p8 }
  0x66   : > { %p2223_p6 = pneg %p2222_p9 }
  0x67   : > { %p2229_p0 = por %p2228_p11, %p2227_p12 }
  0x69   : > { %p2230_p3 = pnand %p2229_p0, %p2223_p6 }
  0x6b   : > { %2233 = shalt.err (!%p2230_p3)
}
  0x6c   : > { %s2234_s16 = scalar_lea.vmem %s2536_s22, 512  ;;  %s2328_s1 = smov [#allocation9]  }
  0x6d   : > { %p2235_p5 = scmp.ne.s32.totalorder %s2536_s22, %s2234_s16  ;;  %s2239_s19 = sshll.u32 %s2328_s1, 4  ;;  %s2240_s19 = int_to_ptr.vmem [resolvable:$false] %s2239_s19 }
  0x6e   : > { %s2241_s18 = scalar_lea.vmem %s2240_s19, 1024  ;;  %p2242_p2 = scmp.lt.s32.totalorder %s2536_s22, %s2240_s19 }
  0x6f   : > { %p2237_p13 = pnand %p2235_p5, %p2457_p7  ;;  %p2243_p9 = scmp.lt.s32.totalorder %s2241_s18, %s2234_s16 }
  0x71   : > { %p2238_p1 = pneg %p2237_p13  ;;  %p2244_p8 = por %p2243_p9, %p2242_p2 }
  0x73   : > { %p2245_p10 = pnand %p2244_p8, %p2238_p1 }
  0x75   : > { %2248 = shalt.err (!%p2245_p10)
}
  0x76   : > { %2050 = dma.hbm_to_vmem [thread:$0]  (!%p2436_p4), %s2533_s21, 512, %s2536_s22, %s2451_s24, %s2877_s25, %s2877_s25, %s2876_s10  }
  0x77   : > { %p2878_p7 = scmp.ne.s32.totalorder %s2874_s9, 0 }
  0x78   : > { %s2566_s30 = sand.u32 (!%p2878_p7), 1, %s2313_s26   ;;  %p2879_p6 = scmp.ne.s32.totalorder (!%p2878_p7), %s2866_s11, 0 }
  0x79   : > { %276 = sbr.rel (%p2878_p7) target bundleno = 1296 (0x510), region = 40  ;;  %s2569_s20 = sshll.u32 (!%p2878_p7), %s2566_s30, 5 }
  0x7a   : > { %s279_s17 = scalar_lea.sflag (!%p2878_p7), [#allocation5], %s2566_s30  ;;  %s2573_s2 = scalar_lea.vmem (!%p2878_p7), [#allocation4], %s2569_s20 }
  0x80   : > { %2296 = dma.done.wait (%p2879_p6), %s279_s17, 512  }
  0x81   : > { %2298 = vsyncadd (%p2879_p6), %s279_s17, 4294966784  ;;  %s287_s24 = sand.u32 1, %s2395_s29   ;;  %s2581_s10 = scalar_lea.vmem [#allocation7], %s2569_s20 }
  0x82   : > { %s288_s9 = scalar_lea.sflag [#allocation8], %s287_s24 }
  0x83   : > { %2300 = dma.done.wait (%p2879_p6), %s288_s9, 1024  }
  0x84   : > { %2302 = vsyncadd (%p2879_p6), %s288_s9, 4294966272  ;;  %p342_p4 = scmp.lt.s32.totalorder %s2395_s29, 1  ;;  %v2329_v0 = vmov 0   ;;  %v2330_v3 = vmov 0.0|0.0   ;;  %vm2331_vm0 = vmmov 0   ;;  %v2332_v4 = vmov 0.0  }
  0x85   : > { %2098 = vset.pattern.permute.xlu0 %v2329_v0  ;;  %1993 = vmatprep.subr.bf16.mxu0 %v2330_v3  ;;  %v347_v5 = vld [vmem:[%s2573_s2] sm:$0xff]  ;;  %v2596_v6 = vld [vmem:[%s2573_s2 + $0x8] sm:$0xff]  ;;  %v349_v7 = vld [vmem:[%s2573_s2 + $0x10] sm:$0xff]  ;;  %s300_s11 = scalar_lea.vmem [#allocation9], %s2569_s20  ;;  %vm381_vm1 = vcmask 130048   ;;  %vm668_vm2 = vcmask 261120  }
  0x86   : > { %s343_s25 = scalar_select %p342_p4, %s2395_s29, 1  ;;  %1996 = vmatprep.subr.bf16.mxu1 %v2330_v3  ;;  %1907 = vmatprep.mubr.msk.f32.mxu0 %vm2331_vm0, %v2332_v4  ;;  %v350_v8 = vld [vmem:[%s2573_s2 + $0x18] sm:$0xff]  ;;  %v351_v10 = vld [vmem:[%s2581_s10] sm:$0xff]  ;;  %v353_v11 = vld [vmem:[%s2581_s10 + $0x10] sm:$0xff]  ;;  %vm841_vm3 = vcmask 64512  }
  0x87   : > { %1914 = vmatprep.mubr.msk.f32.mxu1 %vm2331_vm0, %v2332_v4  ;;  %886 = vxpose.xlu1.b32.start [1/2] (short) (narrow) %v347_v5, 32  ;;  %v352_v12 = vld [vmem:[%s2581_s10 + $0x8] sm:$0xff]  ;;  %v354_v13 = vld [vmem:[%s2581_s10 + $0x18] sm:$0xff]  ;;  %v355_v21 = vld [vmem:[%s300_s11] sm:$0xff]  ;;  %s1613_s19 = sld [smem:[#allocation3]]  ;;  %s2756_s18 = sld [smem:[#allocation3 + $0x1]] }
  0x88   : > { %s1853_s21 = sshll.u32 %s343_s25, 4  ;;  %v356_v15 = vld [vmem:[%s300_s11 + $0x8] sm:$0xff]  ;;  %v358_v16 = vld [vmem:[%s300_s11 + $0x18] sm:$0xff]  ;;  %v357_v22 = vld [vmem:[%s300_s11 + $0x10] sm:$0xff]  ;;  %s2758_s17 = sld [smem:[#allocation3 + $0x2]] }
  0x89   : > { %s346_s8 = scalar_lea.vmem %s2853_s4, %s1853_s21  ;;  %v361_v29 = vld [vmem:[%s2854_s5] sm:$0xff]  ;;  %v362_v30 = vld [vmem:[%s2854_s5 + $0x8] sm:$0xff]  ;;  %s2761_s2 = sld [smem:[#allocation3 + $0x80]] }
  0x8a   : > { %v359_v1 = vld [vmem:[%s346_s8] sm:$0xff]  ;;  %v360_v2 = vld [vmem:[%s346_s8 + $0x8] sm:$0xff]  ;;  %s2766_s24 = sld [smem:[#allocation3 + $0x81]]  ;;  %s2771_s9 = sld [smem:[#allocation3 + $0x82]] }
  0x8b   : > { %365 = vperm.xlu0 %2098, %v359_v1   ;;  %887 = vxpose.xlu1.b32.end [2/2] (short) (narrow) %v2596_v6, 32  ;;  %s341_s10 = scalar_lea.vmem [#allocation10], %s2569_s20  ;;  %s1854_s21 = sshll.u32 %s2395_s29, 9 }
  0x8c   : > { %s1667_s25 = sshll.u32 %s341_s10, 4  ;;  %s2803_s14 = scalar_lea.hbm %s2855_s6, %s1854_s21  ;;  %s2797_s25 = int_to_ptr.vmem [resolvable:$true] %s1667_s25 }
  0x8d   : > { %s1654_s29 = scalar_lea.sflag [#allocation6], %s2566_s30  ;;  %s2249_s8 = scalar_lea.vmem %s2797_s25, 512 }
  0x8e   : > { %p2250_p12 = scmp.ne.s32.totalorder %s2797_s25, %s2249_s8  ;;  %p2880_p11 = scmp.ne.s32.totalorder %s2867_s12, 0 }
  0x8f   : > { %370 = vperm.xlu0 %2098, %v360_v2   ;;  %s2333_s11 = smov [#allocation10]  }
  0x90   : > { %p2251_p0 = pnand %p2250_p12, %p2880_p11  ;;  %s2253_s23 = sshll.u32 %s2333_s11, 4  ;;  %s2254_s23 = int_to_ptr.vmem [resolvable:$false] %s2253_s23 }
  0x91   : > { %s2255_s15 = scalar_lea.vmem %s2254_s23, 1024  ;;  %p2256_p5 = scmp.lt.s32.totalorder %s2797_s25, %s2254_s23 }
  0x92   : > { %p2252_p3 = pneg %p2251_p0  ;;  %p2257_p13 = scmp.lt.s32.totalorder %s2255_s15, %s2249_s8 }
  0x94   : > { %p2258_p1 = por %p2257_p13, %p2256_p5 }
  0x96   : > { %p2259_p2 = pnand %p2258_p1, %p2252_p3 }
  0xad   : > { %1015 = vxpose.xlu0.b32.start [1/2] (short) (narrow) %v349_v7, 32 }
  0xb1   : > { %1016 = vxpose.xlu0.b32.end [2/2] (short) (narrow) %v350_v8, 32 }
 0x107   : > { %v902_v34 = vpop.trf.xlu1 }
 0x10a   : > { %v366_v9 = vpop.permute.xlu0 %365 }
 0x10b   : > { %v373_v17 = vmul.f32 %v366_v9, %v351_v10  ;;  %v375_v18 = vmul.f32 %v366_v9, %v353_v11  ;;  %v2610_v27 = vmul.f32 %v366_v9, %v355_v21  ;;  %v2612_v28 = vmul.f32 %v366_v9, %v357_v22  ;;  %v903_v36 = vpop.trf.xlu1 }
 0x10e   : > { %v371_v14 = vpop.permute.xlu0 %370 }
 0x10f   : > { %v374_v19 = vmul.f32 %v371_v14, %v352_v12  ;;  %v376_v20 = vmul.f32 %v371_v14, %v354_v13  ;;  %v2606_v23 = vmul.f32 %v371_v14, %v356_v15  ;;  %v2608_v24 = vmul.f32 %v371_v14, %v358_v16  ;;  %v904_v42 = vpop.trf.xlu1 }
 0x111   : > { %v1994_v25 = vpack.c.bf16 %v374_v19, %v373_v17  ;;  %v1997_v26 = vpack.c.bf16 %v376_v20, %v375_v18  ;;  %v2000_v31 = vpack.c.bf16 %v2606_v23, %v2610_v27  ;;  %v2003_v32 = vpack.c.bf16 %v2608_v24, %v2612_v28 }
 0x113   : > { %1995 = vmatpush3.bf16.msra.mxu0 %v1994_v25  ;;  %1998 = vmatpush3.bf16.msra.mxu1 %v1997_v26  ;;  %v905_v48 = vpop.trf.xlu1 }
 0x114   : > { %1999 = vmatprep.subr.bf16.mxu0 %v2330_v3  ;;  %2002 = vmatprep.subr.bf16.mxu1 %v2330_v3 }
 0x116   : > { %1908 = vmatmul.mubr.msk.f32.vlgmr.msra.gmra.mrb[0].mxu0 %vm381_vm1, %v361_v29  ;;  %1915 = vmatmul.mubr.msk.f32.vlgmr.msra.gmra.mrb[0].mxu1 %vm381_vm1, %v362_v30 }
 0x117   : > { %2001 = vmatpush3.bf16.msra.mxu0 %v2000_v31  ;;  %2004 = vmatpush3.bf16.msra.mxu1 %v2003_v32 }
 0x118   : > { %1921 = vmatprep.mubr.msk.f32.mxu0 %vm2331_vm0, %v2332_v4  ;;  %1928 = vmatprep.mubr.msk.f32.mxu1 %vm2331_vm0, %v2332_v4 }
 0x11a   : > { %1922 = vmatmul.mubr.msk.f32.vlgmr.msra.gmra.mrb[2].mxu0 %vm381_vm1, %v361_v29  ;;  %1929 = vmatmul.mubr.msk.f32.vlgmr.msra.gmra.mrb[2].mxu1 %vm381_vm1, %v362_v30 }
 0x11b   : > { %1938 = vmatprep.mubr.msk.f32.mxu1 %vm668_vm2, %v349_v7  ;;  %1933 = vmatprep.mubr.msk.f32.mxu0 %vm668_vm2, %v347_v5 }
 0x12d   : > { %v1031_v33 = vpop.trf.xlu0 }
 0x131   : > { %v1032_v35 = vpop.trf.xlu0 }
 0x135   : > { %v1033_v41 = vpop.trf.xlu0 }
 0x139   : > { %v1034_v47 = vpop.trf.xlu0 }
 0x1e9   : > { %v451_v37 = vpop.f32.mrb[0].mxu0  ;;  %v524_v38 = vpop.f32.mrb[0].mxu1 }
 0x1ea   : > { %v1916_v39 = vpop.f32.mrb[1].mxu1  ;;  %1931 = vmatprep.subr.msk.mxu0 %vm668_vm2, %v451_v37  ;;  %1936 = vmatprep.subr.msk.mxu1 %vm668_vm2, %v524_v38  ;;  %v1909_v40 = vpop.f32.mrb[1].mxu0 }
 0x1eb   : > { %1932 = vmatpush3.xpose.msk.msra.mxu0 %vm668_vm2, %v451_v37  ;;  %1937 = vmatpush3.xpose.msk.msra.mxu1 %vm668_vm2, %v524_v38 }
 0x1ec   : > { %2006 = vmatprep.subr.bf16.mxu0 %v1994_v25  ;;  %2010 = vmatprep.subr.bf16.mxu1 %v1997_v26 }
 0x1ed   : > { %v2636_v43 = vpop.f32.mrb[2].mxu1  ;;  %v2638_v44 = vpop.f32.mrb[2].mxu0 }
 0x1ee   : > { %1934 = vmatmul.mubr.msk.f32.vlgmr.msra.gmra.mrb[4].mxu0 %vm668_vm2, %v2596_v6  ;;  %1939 = vmatmul.mubr.msk.f32.vlgmr.msra.gmra.mrb[4].mxu1 %vm668_vm2, %v350_v8  ;;  %v1930_v45 = vpop.f32.mrb[3].mxu1  ;;  %v1923_v46 = vpop.f32.mrb[3].mxu0 }
 0x1ef   : > { %2008 = vmatpush3.bf16.msra.mxu0 %v1994_v25  ;;  %2012 = vmatpush3.bf16.msra.mxu1 %v1997_v26 }
 0x1f0   : > { %1955 = vmatprep.mubr.msk.f32.mxu1 %vm381_vm1, %v1031_v33  ;;  %1945 = vmatprep.mubr.msk.f32.mxu0 %vm381_vm1, %v902_v34 }
 0x1f2   : > { %1946 = vmatmul.mubr.msk.f32.vlgmr.msra.gmra.mrb[6].mxu0 %vm381_vm1, %v903_v36  ;;  %1956 = vmatmul.mubr.msk.f32.vlgmr.msra.gmra.mrb[6].mxu1 %vm381_vm1, %v1032_v35 }
 0x1f3   : > { %1958 = vmatprep.mubr.msk.f32.mxu1 %vm381_vm1, %v1033_v41  ;;  %1948 = vmatprep.mubr.msk.f32.mxu0 %vm381_vm1, %v904_v42 }
 0x1f6   : > { %1949 = vmatmul.mubr.msk.f32.gmra.mrb[8].mxu0 %vm381_vm1, %v905_v48  ;;  %1959 = vmatmul.mubr.msk.f32.gmra.mrb[8].mxu1 %vm381_vm1, %v1034_v47 }
 0x1f7   : > { %1969 = vmatprep.mubr.msk.f32.mxu0 %vm668_vm2, %v2610_v27  ;;  %1980 = vmatprep.mubr.msk.f32.mxu1 %vm668_vm2, %v2612_v28 }
 0x2c1   : > { %v1940_v49 = vpop.f32.mrb[4].mxu1  ;;  %v1935_v50 = vpop.f32.mrb[4].mxu0 }
 0x2c2   : > { %v828_v51 = vpop.f32.mrb[5].mxu1  ;;  %v744_v52 = vpop.f32.mrb[5].mxu0  ;;  %v2669_v16 = vmul.f32 0.17677669, %v1935_v50  ;;  %v2673_v18 = vmul.f32 0.17677669, %v1940_v49 }
 0x2c3   : > { %v2662_v12 = vmul.f32 0.17677669, %v744_v52  ;;  %v2665_v14 = vmul.f32 0.17677669, %v828_v51 }
 0x2c4   : > { %v845_v19 = vsel %vm841_vm3, %v2669_v16, -inf  ;;  %v851_v20 = vsel %vm841_vm3, %v2673_v18, -inf }
 0x2c5   : > { %v1947_v53 = vpop.f32.mrb[6].mxu0  ;;  %v1957_v54 = vpop.f32.mrb[6].mxu1  ;;  %v842_v15 = vsel %vm841_vm3, %v2662_v12, -inf  ;;  %v848_v17 = vsel %vm841_vm3, %v2665_v14, -inf }
 0x2c6   : > { %v1145_v55 = vmul.f32 0.25, %v1947_v53  ;;  %v1149_v56 = vmul.f32 0.25, %v1957_v54  ;;  %v1125_v57 = vpop.f32.mrb[7].mxu1  ;;  %v996_v58 = vpop.f32.mrb[7].mxu0 }
 0x2c7   : > { %v1144_v59 = vmul.f32 0.25, %v996_v58  ;;  %v1148_v3 = vmul.f32 0.25, %v1125_v57 }
 0x2c8   : > { %v1167_v60 = vsel %vm668_vm2, %v1149_v56, -inf  ;;  %v1155_v61 = vsel %vm668_vm2, %v1145_v55, -inf }
 0x2c9   : > { %1168 = vmax.xlane.f32.xlu1 %v1167_v60  ;;  %1156 = vmax.xlane.f32.xlu0 %v1155_v61  ;;  %v1950_v62 = vpop.f32.mrb[8].mxu0  ;;  %v1960_v63 = vpop.f32.mrb[8].mxu1  ;;  %v1152_v0 = vsel %vm668_vm2, %v1144_v59, -inf  ;;  %v1164_v5 = vsel %vm668_vm2, %v1148_v3, -inf }
 0x2ca   : > { %v1006_v1 = vpop.f32.mrb[9].mxu0  ;;  %v1135_v2 = vpop.f32.mrb[9].mxu1  ;;  %v1147_v4 = vmul.f32 0.25, %v1950_v62  ;;  %v1151_v6 = vmul.f32 0.25, %v1960_v63 }
 0x2cb   : > { %v1146_v9 = vmul.f32 0.25, %v1006_v1  ;;  %v1150_v10 = vmul.f32 0.25, %v1135_v2 }
 0x2cc   : > { %v1161_v7 = vsel %vm668_vm2, %v1147_v4, -inf  ;;  %v1173_v8 = vsel %vm668_vm2, %v1151_v6, -inf }
 0x2cd   : > { %1153 = vmax.xlane.f32.xlu1 %v1152_v0  ;;  %v1158_v11 = vsel %vm668_vm2, %v1146_v9, -inf  ;;  %v1170_v13 = vsel %vm668_vm2, %v1150_v10, -inf }
 0x2d1   : > { %1165 = vmax.xlane.f32.xlu1 %v1164_v5 }
 0x2d5   : > { %1162 = vmax.xlane.f32.xlu1 %v1161_v7 }
 0x2d9   : > { %1174 = vmax.xlane.f32.xlu1 %v1173_v8 }
 0x2dd   : > { %1159 = vmax.xlane.f32.xlu1 %v1158_v11 }
 0x2e1   : > { %1171 = vmax.xlane.f32.xlu1 %v1170_v13 }
 0x2e5   : > { %843 = vmax.xlane.f32.xlu1 %v842_v15 }
 0x2e9   : > { %849 = vmax.xlane.f32.xlu1 %v848_v17 }
 0x2ed   : > { %846 = vmax.xlane.f32.xlu1 %v845_v19 }
 0x2f1   : > { %852 = vmax.xlane.f32.xlu1 %v851_v20 }
 0x356   : > { %v1169_v21 = vpop.xlane.xlu1 %1168  ;;  %v1157_v22 = vpop.xlane.xlu0 %1156 }
 0x357   : > { %v1181_v25 = vsub.f32 %v1149_v56, %v1169_v21  ;;  %v1177_v26 = vsub.f32 %v1145_v55, %v1157_v22 }
 0x359   : > { %v1186_v29 = vmul.f32 1.442695, %v1177_v26  ;;  %v1194_v30 = vmul.f32 1.442695, %v1181_v25 }
 0x35a   : > { %v1154_v31 = vpop.xlane.xlu1 %1153 }
 0x35b   : > { %v1176_v32 = vsub.f32 %v1144_v59, %v1154_v31  ;;  %2099 = vpow2.f32 %v1186_v29 }
 0x35c   : > { %2101 = vpow2.f32 %v1194_v30 }
 0x35d   : > { %v1184_v33 = vmul.f32 1.442695, %v1176_v32 }
 0x35e   : > { %v1166_v34 = vpop.xlane.xlu1 %1165 }
 0x35f   : > { %2103 = vpow2.f32 %v1184_v33  ;;  %v1180_v35 = vsub.f32 %v1148_v3, %v1166_v34 }
 0x361   : > { %v1192_v36 = vmul.f32 1.442695, %v1180_v35 }
 0x362   : > { %v1163_v37 = vpop.xlane.xlu1 %1162 }
 0x363   : > { %2105 = vpow2.f32 %v1192_v36  ;;  %v1179_v38 = vsub.f32 %v1147_v4, %v1163_v37 }
 0x365   : > { %v1190_v39 = vmul.f32 1.442695, %v1179_v38  ;;  %v2679_v40 = vpop.eup %2099 }
 0x366   : > { %v1175_v41 = vpop.xlane.xlu1 %1174  ;;  %v1203_v45 = vsel %vm668_vm2, %v2679_v40, 0.0  ;;  %v2683_v46 = vpop.eup %2101 }
 0x367   : > { %2107 = vpow2.f32 %v1190_v39  ;;  %v1183_v42 = vsub.f32 %v1151_v6, %v1175_v41  ;;  %1204 = vadd.xlane.f32.xlu1 %v1203_v45  ;;  %v1215_v52 = vsel %vm668_vm2, %v2683_v46, 0.0 }
 0x369   : > { %v2685_v47 = vpop.eup %2103  ;;  %v1198_v48 = vmul.f32 1.442695, %v1183_v42 }
 0x36a   : > { %v1160_v49 = vpop.xlane.xlu1 %1159  ;;  %v1200_v50 = vsel %vm668_vm2, %v2685_v47, 0.0 }
 0x36b   : > { %2109 = vpow2.f32 %v1198_v48  ;;  %v1178_v51 = vsub.f32 %v1146_v9, %v1160_v49  ;;  %1201 = vadd.xlane.f32.xlu0 %v1200_v50  ;;  %1216 = vadd.xlane.f32.xlu1 %v1215_v52 }
 0x36d   : > { %v2691_v53 = vpop.eup %2105  ;;  %v1188_v54 = vmul.f32 1.442695, %v1178_v51 }
 0x36e   : > { %v1172_v55 = vpop.xlane.xlu1 %1171  ;;  %v1212_v56 = vsel %vm668_vm2, %v2691_v53, 0.0 }
 0x36f   : > { %2111 = vpow2.f32 %v1188_v54  ;;  %v1182_v57 = vsub.f32 %v1150_v10, %v1172_v55  ;;  %1213 = vadd.xlane.f32.xlu0 %v1212_v56 }
 0x371   : > { %v2695_v58 = vpop.eup %2107  ;;  %v1196_v59 = vmul.f32 1.442695, %v1182_v57 }
 0x372   : > { %v844_v60 = vpop.xlane.xlu1 %843  ;;  %v1209_v61 = vsel %vm668_vm2, %v2695_v58, 0.0 }
 0x373   : > { %2113 = vpow2.f32 %v1196_v59  ;;  %v854_v62 = vsub.f32 %v2662_v12, %v844_v60  ;;  %1210 = vadd.xlane.f32.xlu1 %v1209_v61 }
 0x375   : > { %v2700_v63 = vpop.eup %2109  ;;  %v858_v0 = vmul.f32 1.442695, %v854_v62 }
 0x376   : > { %v850_v1 = vpop.xlane.xlu1 %849  ;;  %v1221_v2 = vsel %vm668_vm2, %v2700_v63, 0.0 }
 0x377   : > { %2115 = vpow2.f32 %v858_v0  ;;  %v856_v3 = vsub.f32 %v2665_v14, %v850_v1  ;;  %1222 = vadd.xlane.f32.xlu1 %v1221_v2 }
 0x379   : > { %v2705_v4 = vpop.eup %2111  ;;  %v862_v5 = vmul.f32 1.442695, %v856_v3 }
 0x37a   : > { %v847_v6 = vpop.xlane.xlu1 %846  ;;  %v1206_v7 = vsel %vm668_vm2, %v2705_v4, 0.0 }
 0x37b   : > { %2117 = vpow2.f32 %v862_v5  ;;  %v855_v8 = vsub.f32 %v2669_v16, %v847_v6  ;;  %1207 = vadd.xlane.f32.xlu0 %v1206_v7  ;;  %v1569_v6 = vrot.slane %v2606_v23, 7 }
 0x37d   : > { %v2710_v9 = vpop.eup %2113  ;;  %v860_v10 = vmul.f32 1.442695, %v855_v8  ;;  %v1592_v8 = vrot.slane %v2606_v23, 1 }
 0x37e   : > { %v853_v11 = vpop.xlane.xlu1 %852  ;;  %v1218_v12 = vsel %vm668_vm2, %v2710_v9, 0.0 }
 0x37f   : > { %2119 = vpow2.f32 %v860_v10  ;;  %v857_v13 = vsub.f32 %v2673_v18, %v853_v11  ;;  %1219 = vadd.xlane.f32.xlu0 %v1218_v12  ;;  %v1570_v10 = vrot.slane %v2608_v24, 7  ;;  %v1590_v11 = vrot.slane %v2610_v27, 1 }
 0x381   : > { %v2715_v14 = vpop.eup %2115  ;;  %v864_v15 = vmul.f32 1.442695, %v857_v13  ;;  %v1614_v13 = vstv %s1613_s19 }
 0x382   : > { %v866_v17 = vsel %vm841_vm3, %v2715_v14, 0.0 }
 0x383   : > { %2121 = vpow2.f32 %v864_v15  ;;  %867 = vadd.xlane.f32.xlu0 %v866_v17 }
 0x385   : > { %v2719_v16 = vpop.eup %2117 }
 0x386   : > { %v872_v19 = vsel %vm841_vm3, %v2719_v16, 0.0 }
 0x387   : > { %873 = vadd.xlane.f32.xlu1 %v872_v19 }
 0x389   : > { %v2723_v20 = vpop.eup %2119 }
 0x38a   : > { %v869_v18 = vsel %vm841_vm3, %v2723_v20, 0.0 }
 0x38b   : > { %870 = vadd.xlane.f32.xlu0 %v869_v18  ;;  %v1618_v18 = vstv %s2756_s18 }
 0x38d   : > { %v2727_v21 = vpop.eup %2121 }
 0x38e   : > { %v875_v22 = vsel %vm841_vm3, %v2727_v21, 0.0 }
 0x38f   : > { %876 = vadd.xlane.f32.xlu1 %v875_v22  ;;  %v1591_v22 = vrot.slane %v2612_v28, 1 }
 0x3f4   : > { %v1205_v25 = vpop.xlane.xlu1 %1204 }
 0x3f5   : > { %2123 = vrcp.f32 %v1205_v25 }
 0x3f8   : > { %v1202_v26 = vpop.xlane.xlu0 %1201  ;;  %v1217_v29 = vpop.xlane.xlu1 %1216 }
 0x3f9   : > { %2125 = vrcp.f32 %v1202_v26 }
 0x3fa   : > { %2127 = vrcp.f32 %v1217_v29 }
 0x3fc   : > { %v1214_v30 = vpop.xlane.xlu0 %1213 }
 0x3fd   : > { %2129 = vrcp.f32 %v1214_v30  ;;  %v1630_v30 = vstv %s2761_s2 }
 0x3ff   : > { %v2124_v31 = vpop.eup %2123 }
 0x400   : > { %v1211_v32 = vpop.xlane.xlu1 %1210  ;;  %v1233_v35 = vmul.f32 %v2124_v31, %v2679_v40  ;;  %v1620_v31 = vmul.f32 %v1618_v18, %v2606_v23 }
 0x401   : > { %2131 = vrcp.f32 %v1211_v32 }
 0x403   : > { %v2126_v33 = vpop.eup %2125 }
 0x404   : > { %v1232_v34 = vmul.f32 %v2126_v33, %v2685_v47  ;;  %v2128_v36 = vpop.eup %2127  ;;  %v1223_v39 = vpop.xlane.xlu1 %1222 }
 0x405   : > { %v1237_v45 = vmul.f32 %v2128_v36, %v2683_v46 }
 0x406   : > { %v2013_v37 = vpack.c.bf16 %v1233_v35, %v1232_v34  ;;  %v1619_v34 = vmul.f32 %v1618_v18, %v2610_v27  ;;  %v1634_v35 = vstv %s2766_s24 }
 0x407   : > { %v2130_v38 = vpop.eup %2129 }
 0x408   : > { %v1208_v41 = vpop.xlane.xlu0 %1207  ;;  %2014 = vmatprep.subr.bf16.mxu0 %v2013_v37  ;;  %v1236_v42 = vmul.f32 %v2130_v38, %v2691_v53 }
 0x409   : > { %2133 = vrcp.f32 %v1208_v41  ;;  %2016 = vmatpush3.bf16.msra.mxu0 %v2013_v37 }
 0x40a   : > { %v2021_v48 = vpack.c.bf16 %v1237_v45, %v1236_v42  ;;  %2135 = vrcp.f32 %v1223_v39  ;;  %v1640_v45 = vstv %s2771_s9 }
 0x40b   : > { %v2132_v47 = vpop.eup %2131 }
 0x40c   : > { %v1220_v49 = vpop.xlane.xlu0 %1219  ;;  %2022 = vmatprep.subr.bf16.mxu1 %v2021_v48  ;;  %v1235_v54 = vmul.f32 %v2132_v47, %v2695_v58 }
 0x40d   : > { %2137 = vrcp.f32 %v1220_v49  ;;  %2024 = vmatpush3.bf16.msra.mxu1 %v2021_v48 }
 0x410   : > { %v868_v40 = vpop.xlane.xlu0 %867 }
 0x411   : > { %2139 = vrcp.f32 %v868_v40  ;;  %v1635_v40 = vmul.f32 %v1634_v35, %v2612_v28 }
 0x413   : > { %v2134_v50 = vpop.eup %2133 }
 0x414   : > { %v874_v51 = vpop.xlane.xlu1 %873  ;;  %v1234_v52 = vmul.f32 %v2134_v50, %v2705_v4  ;;  %v2136_v53 = vpop.eup %2135  ;;  %v1564_v4 = vlaneseq }
 0x415   : > { %2141 = vrcp.f32 %v874_v51  ;;  %v1239_v59 = vmul.f32 %v2136_v53, %v2700_v63 }
 0x416   : > { %v2017_v46 = vpack.c.bf16 %v1235_v54, %v1234_v52  ;;  %v1565_v5 = vshrl.u32 %v1564_v4, 7 }
 0x417   : > { %v2138_v55 = vpop.eup %2137 }
 0x418   : > { %v871_v56 = vpop.xlane.xlu0 %870  ;;  %2018 = vmatprep.subr.bf16.mxu0 %v2017_v46  ;;  %v1238_v57 = vmul.f32 %v2138_v55, %v2710_v9  ;;  %vm1571_vm4 = vcmp.lt.s32.totalorder %v1565_v5, 1  ;;  %v1566_v7 = vadd.s32 8, %v1565_v5  ;;  %vm1594_vm5 = vcmp.lt.s32.totalorder %v1565_v5, 7 }
 0x419   : > { %2143 = vrcp.f32 %v871_v56  ;;  %2020 = vmatpush3.bf16.msra.mxu0 %v2017_v46  ;;  %vm1576_vm6 = vcmp.ge.s32.totalorder %v1565_v5, 1  ;;  %v1597_v15 = vsel %vm1594_vm5, %v1592_v8, %v1590_v11  ;;  %v1595_v38 = vsel %vm1594_vm5, %v1590_v11, %v1592_v8 }
 0x41a   : > { %1983 = vmatprep.subr.mxu0 %v2638_v44  ;;  %v2025_v60 = vpack.c.bf16 %v1239_v59, %v1238_v57  ;;  %vm1602_vm7 = vcmp.lt.s32.totalorder %v1566_v7, 15 }
 0x41b   : > { %v2140_v61 = vpop.eup %2139  ;;  %v1610_v25 = vsel %vm1602_vm7, %v1597_v15, 0.0 }
 0x41c   : > { %1970 = vmatmul.mubr.msk.f32.vlgmr.msra.gmra.mrb[10].mxu0 %vm668_vm2, %v2606_v23  ;;  %2026 = vmatprep.subr.bf16.mxu1 %v2025_v60  ;;  %v877_v58 = vpop.xlane.xlu1 %876  ;;  %v882_v62 = vmul.f32 %v2140_v61, %v2715_v14  ;;  %v1568_v14 = vrot.slane %v2612_v28, 7  ;;  %v1636_v23 = vmul.f32 %v1634_v35, %v2608_v24 }
 0x41d   : > { %2145 = vrcp.f32 %v877_v58  ;;  %2028 = vmatpush3.bf16.msra.mxu1 %v2025_v60  ;;  %1984 = vmatpush3.msra.mxu0 %v2638_v44 }
 0x41e   : > { %1985 = vmatprep.mubr.msk.f32.mxu0 %vm841_vm3, %v882_v62  ;;  %1988 = vmatprep.subr.mxu1 %v2636_v43  ;;  %v1575_v19 = vsel %vm1571_vm4, %v1570_v10, %v1568_v14  ;;  %v1573_v29 = vsel %vm1571_vm4, %v1568_v14, %v1570_v10 }
 0x41f   : > { %v2142_v63 = vpop.eup %2141  ;;  %v1588_v33 = vsel %vm1576_vm6, %v1575_v19, 0.0  ;;  %v1632_v39 = vmul.f32 %v1630_v30, %v1573_v29 }
 0x420   : > { %1981 = vmatmul.mubr.msk.f32.vlgmr.msra.gmra.mrb[10].mxu1 %vm668_vm2, %v2608_v24  ;;  %v884_v0 = vmul.f32 %v2142_v63, %v2719_v16  ;;  %v1593_v16 = vrot.slane %v2608_v24, 1  ;;  %v1631_v48 = vmul.f32 %v1630_v30, %v1588_v33 }
 0x421   : > { %1989 = vmatpush3.msra.mxu1 %v2636_v43  ;;  %v1567_v43 = vrot.slane %v2610_v27, 7  ;;  %v1638_v27 = vadd.f32 %v1636_v23, %v1632_v39 }
 0x422   : > { %1990 = vmatprep.mubr.msk.f32.mxu1 %vm841_vm3, %v884_v0  ;;  %v1598_v32 = vsel %vm1594_vm5, %v1593_v16, %v1591_v22  ;;  %v1596_v51 = vsel %vm1594_vm5, %v1591_v22, %v1593_v16  ;;  %v1637_v53 = vadd.f32 %v1635_v40, %v1631_v48 }
 0x423   : > { %v2144_v1 = vpop.eup %2143  ;;  %v1574_v9 = vsel %vm1571_vm4, %v1569_v6, %v1567_v43  ;;  %v1572_v12 = vsel %vm1571_vm4, %v1567_v43, %v1569_v6  ;;  %v1612_v42 = vsel %vm1602_vm7, %v1598_v32, 0.0  ;;  %v1641_v57 = vmul.f32 %v1640_v45, %v1596_v51 }
 0x424   : > { %v883_v2 = vmul.f32 %v2144_v1, %v2723_v20  ;;  %v1586_v17 = vsel %vm1576_vm6, %v1574_v9, 0.0  ;;  %v1616_v20 = vmul.f32 %v1614_v13, %v1572_v12  ;;  %v1642_v50 = vmul.f32 %v1640_v45, %v1612_v42 }
 0x425   : > { %v1615_v26 = vmul.f32 %v1614_v13, %v1586_v17  ;;  %v1643_v59 = vadd.f32 %v1641_v57, %v1637_v53 }
 0x426   : > { %1986 = vmatmul.mubr.msk.f32.vlgmr.msra.gmra.mrb[10].mxu0 %vm841_vm3, %v883_v2  ;;  %v1622_v36 = vadd.f32 %v1620_v31, %v1616_v20  ;;  %v1644_v24 = vadd.f32 %v1642_v50, %v1638_v27 }
 0x427   : > { %v2146_v44 = vpop.eup %2145  ;;  %v1621_v41 = vadd.f32 %v1619_v34, %v1615_v26 }
 0x428   : > { %v885_v3 = vmul.f32 %v2146_v44, %v2727_v21  ;;  %v1624_v21 = vstv %s2758_s17 }
 0x429   : > { %v1626_v37 = vmul.f32 %v1624_v21, %v1610_v25  ;;  %v1625_v49 = vmul.f32 %v1624_v21, %v1595_v38 }
 0x42a   : > { %1991 = vmatmul.mubr.msk.f32.vlgmr.msra.gmra.mrb[10].mxu1 %vm841_vm3, %v885_v3 }
 0x42b   : > { %v1628_v47 = vadd.f32 %v1626_v37, %v1622_v36  ;;  %v1627_v54 = vadd.f32 %v1625_v49, %v1621_v41 }
 0x4f9   : > { %v1987_v52 = vpop.f32.mrb[10].mxu0 }
 0x4fa   : > { %v1646_v46 = vadd.f32 %v1987_v52, %v1628_v47  ;;  %v1474_v55 = vpop.f32.mrb[11].mxu0 }
 0x4fb   : > { %v1645_v56 = vadd.f32 %v1627_v54, %v1474_v55 }
 0x4fc   : > { %1650 = vst.msk [vmem:[%s341_s10 + $0x8] sm:$0xff] %vm668_vm2, %v1646_v46 }
 0x4fd   : > { %1649 = vst.msk [vmem:[%s341_s10] sm:$0xff] %vm668_vm2, %v1645_v56  ;;  %v1992_v28 = vpop.f32.mrb[10].mxu1 }
 0x4fe   : > { %v1648_v60 = vadd.f32 %v1992_v28, %v1644_v24  ;;  %v1555_v61 = vpop.f32.mrb[11].mxu1 }
 0x4ff   : > { %v1647_v58 = vadd.f32 %v1643_v59, %v1555_v61 }
 0x500   : > { %1652 = vst.msk [vmem:[%s341_s10 + $0x18] sm:$0xff] %vm668_vm2, %v1648_v60 }
 0x501   : > { %1651 = vst.msk [vmem:[%s341_s10 + $0x10] sm:$0xff] %vm668_vm2, %v1647_v58 }
 0x502   : > { %2262 = shalt.err (!%p2259_p2)
}
 0x503   : > { %s2263_s16 = scalar_lea.hbm %s2803_s14, 512  ;;  %s2267_s18 = scalar_lea.hbm %s2855_s6, 1024 }
 0x504   : > { %p2264_p9 = scmp.ne.s32.totalorder %s2803_s14, %s2263_s16  ;;  %p2268_p7 = scmp.lt.u32.totalorder %s2803_s14, %s2855_s6 }
 0x505   : > { %p2269_p6 = scmp.lt.u32.totalorder %s2267_s18, %s2263_s16  ;;  %p2271_p12 = scmp.lt.u32.totalorder %s2263_s16, %s2803_s14 }
 0x506   : > { %p2265_p8 = pnand %p2264_p9, %p2880_p11 }
 0x507   : > { %p2270_p4 = por %p2269_p6, %p2268_p7 }
 0x508   : > { %p2266_p10 = pneg %p2265_p8 }
 0x509   : > { %p2272_p0 = por %p2271_p12, %p2270_p4 }
 0x50b   : > { %p2273_p3 = pnand %p2272_p0, %p2266_p10 }
 0x50d   : > { %2276 = shalt.err (!%p2273_p3)
}
 0x50e   : > { %s2334_s24 = smov 128   ;;  %s2335_s9 = smov 8  }
 0x50f   : > { %2039 = dma.vmem_to_hbm [thread:$0]  (%p2880_p11), %s2797_s25, 512, %s2803_s14, %s1654_s29, %s2334_s24, %s2334_s24, %s2335_s9  }
 0x510 PF: > { %s1682_s10 = sand.u32 1, %s2309_s0   ;;  %p2881_p5 = scmp.ne.s32.totalorder %s2868_s13, 0 }
 0x511   : > { %p2882_p13 = scmp.ge.s32.totalorder %s2321_s28, 2  ;;  %s1683_s21 = scalar_lea.sflag [#allocation6], %s1682_s10 }
 0x513   : > { %p2052_p1 = pnand %p2882_p13, %p2881_p5 }
 0x515   : > { %2304 = dma.done.wait (!%p2052_p1), %s1683_s21, 512  }
 0x516   : > { %2306 = vsyncadd (!%p2052_p1), %s1683_s21, 4294966784  ;;  %s2883_s20 = sld [smem:[#allocation15_spill]]  ;;  %p28_p2 = scmp.ge.s32.totalorder %s2399_s7, 4  }
 0x517   : > { %s2884_s0 = smov %s2313_s26  ;;  %s2885_s26 = smov %s2317_s27 }
 0x518   : > { %s2887_s28 = smov %s2399_s7  ;;  %30 = sbr.rel (!%p28_p2) target bundleno = 23 (0x17), region = 112 }
 0x51c   : > { %s2886_s27 = smov %s2883_s20 }
 0x51f   :  { %1688 = vsyncpa [#allocation5], 1 }
 0x520   :  { %1690 = vsyncpa [#allocation5 + $0x1], 1 }
 0x521   :  { %1691 = vsyncpa [#allocation8], 1 }
 0x522   :  { %1693 = vsyncpa [#allocation8 + $0x1], 1 }
 0x523   :  { %1694 = vsyncpa [#allocation6], 1 }
 0x524   :  { %1696 = vsyncpa [#allocation6 + $0x1], 1 }

</bundles_post_ra>
